<compile_context>
chip_gen: v7x
topology: tpu7x:2x2x1
jax: 0.10.0
libtpu: 0.0.40
codegen_flags: <defaults>
</compile_context>

<pallas_src>
import functools

import jax
import jax.numpy as jnp
from jax.experimental import pallas as pl
from jax.experimental.pallas import tpu as pltpu


def _resolution_limiter_kernel(pos_ref, wt_ref, b_ref, out_ref, *, resolution):
    # pos_ref: (D, tile_n)  coordinates on sublanes, sample index on lanes
    # wt_ref:  (F, D)       encoding weight, transposed
    # b_ref:   (F, 1)       encoding bias
    # out_ref: (F, tile_n)  lane-dense transposed output
    pos = pos_ref[...]
    wt = wt_ref[...]
    D = pos.shape[0]

    # --- quantize the last coordinate (all intermediates kept 2-D) ---------
    z = pos[D - 1:D, :]                                   # (1, tile_n)
    z_res = (z + 1.0) * (0.5 * (resolution - 1.0))        # (1, tile_n)
    z_lower = jnp.floor(z_res)
    z_upper = jnp.ceil(z_res)
    scale = 2.0 / (resolution - 1.0)
    z_lo_mapped = scale * z_lower - 1.0                   # (1, tile_n)
    z_up_mapped = scale * z_upper - 1.0                   # (1, tile_n)

    # --- synthetic linear encoding via VPU broadcast FMAs ------------------
    # head = contribution of the first D-1 (unchanged) coordinates.
    if D > 1:
        head = wt[:, 0:1] * pos[0:1, :]                   # (F, tile_n)
        for d in range(1, D - 1):
            head = head + wt[:, d:d + 1] * pos[d:d + 1, :]
    else:
        head = jnp.zeros(out_ref.shape, jnp.float32)

    w_last = wt[:, D - 1:D]                               # (F, 1)

    # The two sample points differ only in the last coordinate; since this
    # encoding is linear, samples_upper is samples_lower plus a rank-1 delta.
    # TODO(synk): if a nonlinear encoding replaces the synthetic linear one,
    # both encodings must be evaluated explicitly here.
    s_lower = head + w_last * z_lo_mapped                 # (F, tile_n)
    s_upper = s_lower + w_last * (z_up_mapped - z_lo_mapped)

    # --- blend; bias added once (blend weights sum to 1) -------------------
    x = z_res - z_lower                                   # (1, tile_n)
    out_ref[...] = (x * s_upper + (1.0 - x) * s_lower + b_ref[...]).astype(
        out_ref.dtype)


def resolution_limiter(positions, weight, bias, *, resolution=20, tile_n=512):
    """positions: (..., D) f32; weight: (D, F); bias: (F,). Returns (..., F)."""
    assert resolution >= 2, "resolution must be >= 2"
    orig_shape = positions.shape
    D = orig_shape[-1]
    F = weight.shape[-1]

    pos2d = positions.reshape(-1, D).astype(jnp.float32)
    N = pos2d.shape[0]

    LANE = 128
    # tile_n: multiple of 128, no larger than N rounded up to a lane multiple.
    n_lane = ((N + LANE - 1) // LANE) * LANE
    tile_n = min(((tile_n + LANE - 1) // LANE) * LANE, n_lane)
    n_pad = ((N + tile_n - 1) // tile_n) * tile_n

    if n_pad != N:
        pos2d = jnp.pad(pos2d, ((0, n_pad - N), (0, 0)))

    # Layout plumbing in the wrapper: N on lanes, F on sublanes in the kernel.
    pos_t = pos2d.T                                       # (D, n_pad)
    w_t = weight.astype(jnp.float32).T                    # (F, D)
    b2d = bias.astype(jnp.float32).reshape(F, 1)          # (F, 1)

    kernel = functools.partial(_resolution_limiter_kernel,
                               resolution=float(resolution))

    out_t = pl.pallas_call(
        kernel,
        out_shape=jax.ShapeDtypeStruct((F, n_pad), jnp.float32),
        grid_spec=pltpu.PrefetchScalarGridSpec(
            num_scalar_prefetch=0,
            grid=(n_pad // tile_n,),
            in_specs=[
                pl.BlockSpec((D, tile_n), lambda i: (0, i)),
                pl.BlockSpec((F, D), lambda i: (0, 0)),
                pl.BlockSpec((F, 1), lambda i: (0, 0)),
            ],
            out_specs=pl.BlockSpec((F, tile_n), lambda i: (0, i)),
        ),
        compiler_params=pltpu.CompilerParams(
            dimension_semantics=("parallel",)),
    )(pos_t, w_t, b2d)

    out = out_t.T[:N]                                     # (N, F)
    return out.reshape(*orig_shape[:-1], F)


def _reference(positions, weight, bias, resolution=20):
    # Pure-JAX reference mirroring the PyTorch module semantics
    # (evaluates the encoding twice, bias inside each evaluation).
    z = positions[..., -1]
    z_res = (z + 1.0) / 2.0 * (resolution - 1)
    z_upper = jnp.ceil(z_res)
    z_lower = jnp.floor(z_res)
    scale = 2.0 / (resolution - 1.0)
    head = positions[..., :-1]
    pos_up = jnp.concatenate([head, (scale * z_upper - 1.0)[..., None]], axis=-1)
    pos_lo = jnp.concatenate([head, (scale * z_lower - 1.0)[..., None]], axis=-1)
    enc = lambda p: p @ weight + bias
    x = (z_res - z_lower)[..., None]
    return x * enc(pos_up) + (1.0 - x) * enc(pos_lo)


if __name__ == "__main__":
    key = jax.random.PRNGKey(0)
    k_pos, k_w, k_b = jax.random.split(key, 3)

    D = 3            # (x, y, z) coordinates
    F = 32           # encoding output features
    batch, npts = 4, 256   # batch dims -> N = 1024 flattened positions
    resolution = 20

    positions = jax.random.uniform(k_pos, (batch, npts, D), jnp.float32,
                                   minval=-1.0, maxval=1.0)
    weight = jax.random.normal(k_w, (D, F), jnp.float32) * 0.1
    bias = jax.random.normal(k_b, (F,), jnp.float32) * 0.01

    out = resolution_limiter(positions, weight, bias,
                             resolution=resolution, tile_n=512)
    out = jax.block_until_ready(out)

    ref = _reference(positions, weight, bias, resolution=resolution)
    assert out.shape == (batch, npts, F)
    assert jnp.allclose(out, ref, atol=1e-5, rtol=1e-5), "mismatch vs reference"

    print("KERNEL_OK")
</pallas_src>

<mosaic_0001>
module attributes {stable_mosaic.version = 11 : i64} {
  func.func @_resolution_limiter_kernel(%arg0: i32, %arg1: memref<3x512xf32, #tpu.memory_space<vmem>>, %arg2: memref<32x3xf32, #tpu.memory_space<vmem>>, %arg3: memref<32x1xf32, #tpu.memory_space<vmem>>, %arg4: memref<32x512xf32, #tpu.memory_space<vmem>>) attributes {dimension_semantics = [#tpu.dimension_semantics<parallel>], iteration_bounds = array<i64: 2>, scalar_prefetch = 0 : i64, scratch_operands = 0 : i64, tpu.core_type = #tpu.core_type<tc>, window_params = [{transform_indices = @transform_0, window_bounds = array<i64: 3, 512>}, {pipeline_mode = #tpu.pipeline_mode<synchronous>, transform_indices = @transform_1, window_bounds = array<i64: 32, 3>}, {pipeline_mode = #tpu.pipeline_mode<synchronous>, transform_indices = @transform_2, window_bounds = array<i64: 32, 1>}, {transform_indices = @transform_3, window_bounds = array<i64: 32, 512>}]} {
    %c0 = arith.constant 0 : index
    %c0_0 = arith.constant 0 : index
    %0 = vector.load %arg1[%c0, %c0_0] : memref<3x512xf32, #tpu.memory_space<vmem>>, vector<3x512xf32>
    %c0_1 = arith.constant 0 : index
    %c0_2 = arith.constant 0 : index
    %1 = vector.load %arg2[%c0_1, %c0_2] : memref<32x3xf32, #tpu.memory_space<vmem>>, vector<32x3xf32>
    %2 = vector.extract_strided_slice %0 {offsets = [2, 0], sizes = [1, 512], strides = [1, 1]} : vector<3x512xf32> to vector<1x512xf32>
    %cst = arith.constant 1.000000e+00 : f32
    %3 = vector.broadcast %cst : f32 to vector<1x512xf32>
    %4 = arith.addf %2, %3 : vector<1x512xf32>
    %cst_3 = arith.constant 9.500000e+00 : f32
    %5 = vector.broadcast %cst_3 : f32 to vector<1x512xf32>
    %6 = arith.mulf %4, %5 : vector<1x512xf32>
    %7 = math.floor %6 : vector<1x512xf32>
    %8 = math.ceil %6 : vector<1x512xf32>
    %cst_4 = arith.constant 0.105263159 : f32
    %9 = vector.broadcast %cst_4 : f32 to vector<1x512xf32>
    %10 = arith.mulf %9, %7 : vector<1x512xf32>
    %cst_5 = arith.constant 1.000000e+00 : f32
    %11 = vector.broadcast %cst_5 : f32 to vector<1x512xf32>
    %12 = arith.subf %10, %11 : vector<1x512xf32>
    %cst_6 = arith.constant 0.105263159 : f32
    %13 = vector.broadcast %cst_6 : f32 to vector<1x512xf32>
    %14 = arith.mulf %13, %8 : vector<1x512xf32>
    %cst_7 = arith.constant 1.000000e+00 : f32
    %15 = vector.broadcast %cst_7 : f32 to vector<1x512xf32>
    %16 = arith.subf %14, %15 : vector<1x512xf32>
    %17 = vector.extract_strided_slice %1 {offsets = [0, 0], sizes = [32, 1], strides = [1, 1]} : vector<32x3xf32> to vector<32x1xf32>
    %18 = vector.extract_strided_slice %0 {offsets = [0, 0], sizes = [1, 512], strides = [1, 1]} : vector<3x512xf32> to vector<1x512xf32>
    %19 = vector.broadcast %17 : vector<32x1xf32> to vector<32x512xf32>
    %20 = vector.broadcast %18 : vector<1x512xf32> to vector<32x512xf32>
    %21 = arith.mulf %19, %20 : vector<32x512xf32>
    %22 = vector.extract_strided_slice %1 {offsets = [0, 1], sizes = [32, 1], strides = [1, 1]} : vector<32x3xf32> to vector<32x1xf32>
    %23 = vector.extract_strided_slice %0 {offsets = [1, 0], sizes = [1, 512], strides = [1, 1]} : vector<3x512xf32> to vector<1x512xf32>
    %24 = vector.broadcast %22 : vector<32x1xf32> to vector<32x512xf32>
    %25 = vector.broadcast %23 : vector<1x512xf32> to vector<32x512xf32>
    %26 = arith.mulf %24, %25 : vector<32x512xf32>
    %27 = arith.addf %21, %26 : vector<32x512xf32>
    %28 = vector.extract_strided_slice %1 {offsets = [0, 2], sizes = [32, 1], strides = [1, 1]} : vector<32x3xf32> to vector<32x1xf32>
    %29 = vector.broadcast %28 : vector<32x1xf32> to vector<32x512xf32>
    %30 = vector.broadcast %12 : vector<1x512xf32> to vector<32x512xf32>
    %31 = arith.mulf %29, %30 : vector<32x512xf32>
    %32 = arith.addf %27, %31 : vector<32x512xf32>
    %33 = arith.subf %16, %12 : vector<1x512xf32>
    %34 = vector.broadcast %28 : vector<32x1xf32> to vector<32x512xf32>
    %35 = vector.broadcast %33 : vector<1x512xf32> to vector<32x512xf32>
    %36 = arith.mulf %34, %35 : vector<32x512xf32>
    %37 = arith.addf %32, %36 : vector<32x512xf32>
    %38 = arith.subf %6, %7 : vector<1x512xf32>
    %39 = vector.broadcast %38 : vector<1x512xf32> to vector<32x512xf32>
    %40 = arith.mulf %39, %37 : vector<32x512xf32>
    %cst_8 = arith.constant 1.000000e+00 : f32
    %41 = vector.broadcast %cst_8 : f32 to vector<1x512xf32>
    %42 = arith.subf %41, %38 : vector<1x512xf32>
    %43 = vector.broadcast %42 : vector<1x512xf32> to vector<32x512xf32>
    %44 = arith.mulf %43, %32 : vector<32x512xf32>
    %45 = arith.addf %40, %44 : vector<32x512xf32>
    %c0_9 = arith.constant 0 : index
    %c0_10 = arith.constant 0 : index
    %46 = vector.load %arg3[%c0_9, %c0_10] : memref<32x1xf32, #tpu.memory_space<vmem>>, vector<32x1xf32>
    %47 = vector.broadcast %46 : vector<32x1xf32> to vector<32x512xf32>
    %48 = arith.addf %45, %47 : vector<32x512xf32>
    %c0_11 = arith.constant 0 : index
    %c0_12 = arith.constant 0 : index
    %49 = vector.load %arg4[%c0_11, %c0_12] : memref<32x512xf32, #tpu.memory_space<vmem>>, vector<32x512xf32>
    tpu.vector_store %arg4[%c0_11, %c0_12], %48 {strides = array<i32>} : memref<32x512xf32, #tpu.memory_space<vmem>>, vector<32x512xf32>,
    return
  }
  func.func @transform_0(%arg0: i32) -> (i32, i32) {
    %c0_i32 = arith.constant 0 : i32
    %c0_i32_0 = arith.constant 0 : i32
    return %c0_i32, %arg0 : i32, i32
  }
  func.func @transform_1(%arg0: i32) -> (i32, i32) {
    %c0_i32 = arith.constant 0 : i32
    %c0_i32_0 = arith.constant 0 : i32
    %c0_i32_1 = arith.constant 0 : i32
    return %c0_i32, %c0_i32_0 : i32, i32
  }
  func.func @transform_2(%arg0: i32) -> (i32, i32) {
    %c0_i32 = arith.constant 0 : i32
    %c0_i32_0 = arith.constant 0 : i32
    %c0_i32_1 = arith.constant 0 : i32
    return %c0_i32, %c0_i32_0 : i32, i32
  }
  func.func @transform_3(%arg0: i32) -> (i32, i32) {
    %c0_i32 = arith.constant 0 : i32
    %c0_i32_0 = arith.constant 0 : i32
    return %c0_i32, %arg0 : i32, i32
  }
}

</mosaic_0001>

<bundles_post_ra>
// kernel: tpu_custom_call.1
= control target key start
LH: loop header
LB: loop body
LE: loop exit
PB: predicated region body
PF: predicated region fallthrough
CT: control target
= control target key end

     0   :  { %8 = vsyncpa [#allocation3], 0  ;;  %s1258_s0 = inlined_call_operand.vmem [shape: f32[3,1024], index: 0, kind: input, shape index: {}]   ;;  %s1259_s1 = inlined_call_operand.vmem [shape: f32[32,3], index: 1, kind: input, shape index: {}]   ;;  %s1260_s2 = inlined_call_operand.vmem [shape: f32[32,1], index: 2, kind: input, shape index: {}]   ;;  %s1261_s3 = inlined_call_operand.hbm [shape: f32[32,1024], index: 3, kind: output, shape index: {}]  }
   0x1   :  { %10 = vsyncpa [#allocation3 + $0x1], 0  ;;  %s931_s12 = smov 0   ;;  %s933_s13 = smov 0  }
   0x2   :  { %s935_s14 = smov 0   ;;  %s937_s15 = smov 0  }
   0x3 LB: > { %s952_s16 = sadd.s32 4294967295, %s902_s15   ;;  %s770_s17 = sadd.s32 4294967294, %s902_s15   ;;  %s902_s15 = sphi %s937_s15, %s1267_s15   ;;  %s898_s14 = sphi %s935_s14, %s1266_s14   ;;  %s894_s13 = sphi %s933_s13, %s1265_s13   ;;  %s890_s12 = sphi %s931_s12, %s1264_s12  }
   0x4   : > { %s956_s18 = sadd.s32 1, %s902_s15   ;;  %s91_s19 = sadd.s32 1, %s898_s14 }
   0x5   : > { %s88_s20 = ssub.s32 %s902_s15, %s956_s18  ;;  %p101_p0 = scmp.ne.s32.totalorder %s898_s14, %s894_s13 }
   0x6   : > { %p89_p1 = scmp.eq.s32.totalorder %s88_s20, 0  ;;  %p102_p2 = scmp.eq.s32.totalorder %s952_s16, 1 }
   0x7   : > { %p107_p3 = scmp.ne.s32.totalorder %s894_s13, %s890_s12  ;;  %p108_p4 = scmp.eq.s32.totalorder %s770_s17, 1 }
   0x8   : > { %s967_s21 = scalar_select %p89_p1, %s898_s14, %s91_s19  }
   0x9   : > { %p969_p5 = por %p102_p2, %p101_p0  ;;  %p973_p6 = por %p108_p4, %p107_p3 }
   0xa   : > { %p773_p7 = scmp.ge.s32.totalorder %s902_s15, 1  ;;  %p141_p8 = scmp.lt.s32.totalorder %s902_s15, 3 }
   0xc   : > { %p142_p9 = pnand %p773_p7, %p141_p8 }
   0xd   : > { %v176_v0 = vld [vmem:[%s1259_s1 + $0x10] sm:$0xff] (!%p142_p9)  ;;  %v174_v1 = vld [vmem:[%s1259_s1] sm:$0xff] (!%p142_p9)  ;;  %v904_v2 = vmov (!%p142_p9), 0   ;;  %v177_v3 = vld [vmem:[%s1259_s1 + $0x18] sm:$0xff] (!%p142_p9)  ;;  %v905_v5 = vmov (!%p142_p9), 1   ;;  %v906_v6 = vmov (!%p142_p9), 2   ;;  %v216_v15 = vlaneseq (!%p142_p9) }
   0xe   : > { %145 = sbr.rel (%p142_p9) target bundleno = 214 (0xd6), region = 32  ;;  %833 = vset.pattern.permute.xlu1 (!%p142_p9), %v904_v2  ;;  %832 = vset.pattern.permute.xlu0 (!%p142_p9), %v904_v2  ;;  %v175_v4 = vld [vmem:[%s1259_s1 + $0x8] sm:$0xff] (!%p142_p9)  ;;  %v638_v7 = vld [vmem:[%s1260_s2] sm:$0xff] (!%p142_p9)  ;;  %v641_v8 = vld [vmem:[%s1260_s2 + $0x18] sm:$0xff] (!%p142_p9)  ;;  %s775_s19 = sshll.u32 (!%p142_p9), %s952_s16, 2 }
   0xf   : > { %206 = vperm.xlu1 (!%p142_p9), %833, %v176_v0   ;;  %196 = vperm.xlu0 (!%p142_p9), %832, %v174_v1   ;;  %v639_v9 = vld [vmem:[%s1260_s2 + $0x8] sm:$0xff] (!%p142_p9)  ;;  %v640_v10 = vld [vmem:[%s1260_s2 + $0x10] sm:$0xff] (!%p142_p9)  ;;  %p166_p10 = scmp.lt.s32.totalorder (!%p142_p9), %s775_s19, 7  ;;  %v217_v18 = vshrl.u32 (!%p142_p9), %v216_v15, 7  ;;  %s162_s27 = sand.u32 (!%p142_p9), 1, %s894_s13  }
  0x10   : > { %s774_s28 = sshll.u32 (!%p142_p9), %s162_s27, 7  ;;  %s786_s30 = sshll.u32 (!%p142_p9), %s952_s16, 9 }
  0x11   : > { %v218_v23 = vsub.s32 (!%p142_p9), 0, %v217_v18  ;;  %v222_v24 = vsub.s32 (!%p142_p9), 4, %v217_v18  ;;  %v286_v29 = vsub.s32 (!%p142_p9), 1, %v217_v18  ;;  %v290_v30 = vsub.s32 (!%p142_p9), 5, %v217_v18  ;;  %s1132_s29 = scalar_lea.vmem (!%p142_p9), [#allocation2], %s774_s28  ;;  %s1207_s6 = scalar_lea.hbm (!%p142_p9), %s1261_s3, %s786_s30 }
  0x12   : > { %v372_v45 = vsub.s32 (!%p142_p9), 2, %v217_v18  ;;  %v376_v46 = vsub.s32 (!%p142_p9), 6, %v217_v18  ;;  %s708_s4 = sshll.u32 (!%p142_p9), %s1132_s29, 4  ;;  %s1217_s7 = scalar_lea.sflag (!%p142_p9), [#allocation3], %s162_s27  ;;  %s1209_s4 = int_to_ptr.vmem [resolvable:$true] %s708_s4 }
  0x13   : > { %211 = vperm.xlu1 (!%p142_p9), %833, %v177_v3   ;;  %201 = vperm.xlu0 (!%p142_p9), %832, %v175_v4   ;;  %s840_s8 = scalar_lea.vmem (!%p142_p9), %s1209_s4, 2048  ;;  %s907_s9 = smov (!%p142_p9), [#allocation2]  }
  0x14   : > { %p841_p11 = scmp.ne.s32.totalorder (!%p142_p9), %s1209_s4, %s840_s8  ;;  %s844_s10 = sshll.u32 (!%p142_p9), %s907_s9, 4  ;;  %s845_s10 = int_to_ptr.vmem [resolvable:$false] %s844_s10 }
  0x15   : > { %s1269_s19 = smov (!%p166_p10, %s775_s19), 7  ;;  %s846_s11 = scalar_lea.vmem %s845_s10, 4096 }
  0x16   : > { %s776_s20 = sshll.u32 %s1269_s19, 2  ;;  %p842_p12 = pnand %p841_p11, %p969_p5 }
  0x17   : > { %835 = vset.pattern.permute.xlu1 %v905_v5  ;;  %834 = vset.pattern.permute.xlu0 %v905_v5  ;;  %s169_s26 = scalar_lea.vmem %s1258_s0, %s776_s20  ;;  %p847_p0 = scmp.lt.s32.totalorder %s1209_s4, %s845_s10 }
  0x18   : > { %273 = vperm.xlu1 %835, %v175_v4   ;;  %269 = vperm.xlu0 %834, %v174_v1   ;;  %v172_v11 = vld [vmem:[%s169_s26] sm:$0x77]  ;;  %v173_v12 = vld [vmem:[%s169_s26 + $0x8] sm:$0x77]  ;;  %p843_p13 = pneg %p842_p12  ;;  %p848_p1 = scmp.lt.s32.totalorder %s846_s11, %s840_s8 }
  0x19   : > { %v178_v13 = vadd.f32 1.0, %v172_v11  ;;  %v179_v14 = vadd.f32 1.0, %v173_v12  ;;  %v219_v31 = vrot.slane %v172_v11, %v218_v23  ;;  %v223_v32 = vrot.slane %v172_v11, %v222_v24 }
  0x1a   : > { %v227_v37 = vrot.slane %v173_v12, %v218_v23  ;;  %v231_v38 = vrot.slane %v173_v12, %v222_v24  ;;  %v287_v39 = vrot.slane %v172_v11, %v286_v29  ;;  %v291_v41 = vrot.slane %v172_v11, %v290_v30  ;;  %p849_p2 = por %p848_p1, %p847_p0 }
  0x1b   : > { %v180_v16 = vmul.f32 9.5, %v178_v13  ;;  %v181_v17 = vmul.f32 9.5, %v179_v14  ;;  %v295_v42 = vrot.slane %v173_v12, %v286_v29  ;;  %v299_v43 = vrot.slane %v173_v12, %v290_v30 }
  0x1c   : > { %277 = vperm.xlu1 %835, %v176_v0   ;;  %281 = vperm.xlu0 %834, %v177_v3   ;;  %v1007_v47 = vrot.slane %v219_v31, %v218_v23  ;;  %v1009_v48 = vrot.slane %v223_v32, %v218_v23  ;;  %v1011_v51 = vrot.slane %v227_v37, %v218_v23  ;;  %p850_p3 = pnand %p849_p2, %p843_p13 }
  0x1d   : > { %v182_v19 = vfloor.f32 %v180_v16  ;;  %v183_v20 = vfloor.f32 %v181_v17  ;;  %v184_v21 = vceil.f32 %v180_v16  ;;  %v185_v22 = vceil.f32 %v181_v17 }
  0x1e   : > { %v1013_v52 = vrot.slane %v231_v38, %v218_v23  ;;  %v1015_v53 = vrot.slane %v287_v39, %v286_v29  ;;  %v1017_v55 = vrot.slane %v291_v41, %v286_v29  ;;  %v1019_v56 = vrot.slane %v295_v42, %v286_v29 }
  0x1f   : > { %v186_v25 = vmul.f32 0.10526316, %v182_v19  ;;  %v187_v26 = vmul.f32 0.10526316, %v183_v20  ;;  %v190_v27 = vmul.f32 0.10526316, %v184_v21  ;;  %v510_v40 = vsub.f32 %v180_v16, %v182_v19 }
  0x20   : > { %836 = vset.pattern.permute.xlu1 %v906_v6  ;;  %837 = vset.pattern.permute.xlu0 %v906_v6  ;;  %v191_v28 = vmul.f32 0.10526316, %v185_v22  ;;  %v511_v44 = vsub.f32 %v181_v17, %v183_v20  ;;  %v1021_v57 = vrot.slane %v299_v43, %v286_v29 }
  0x21   : > { %353 = vperm.xlu1 %836, %v174_v1   ;;  %357 = vperm.xlu0 %837, %v175_v4   ;;  %v777_v33 = vadd.f32 -1.0, %v186_v25  ;;  %v778_v34 = vadd.f32 -1.0, %v187_v26  ;;  %v779_v35 = vadd.f32 -1.0, %v190_v27  ;;  %v566_v54 = vsub.f32 1.0, %v510_v40 }
  0x22   : > { %v780_v36 = vadd.f32 -1.0, %v191_v28  ;;  %v567_v58 = vsub.f32 1.0, %v511_v44  ;;  %v517_v5 = vrot.slane %v510_v40, %v372_v45  ;;  %v521_v6 = vrot.slane %v510_v40, %v376_v46 }
  0x23   : > { %v438_v49 = vsub.f32 %v779_v35, %v777_v33  ;;  %v373_v59 = vrot.slane %v777_v33, %v372_v45  ;;  %v377_v60 = vrot.slane %v777_v33, %v376_v46  ;;  %v381_v61 = vrot.slane %v778_v34, %v372_v45 }
  0x24   : > { %v439_v50 = vsub.f32 %v780_v36, %v778_v34  ;;  %v385_v62 = vrot.slane %v778_v34, %v376_v46  ;;  %v581_v11 = vrot.slane %v567_v58, %v372_v45  ;;  %v585_v12 = vrot.slane %v567_v58, %v376_v46 }
  0x25   : > { %361 = vperm.xlu1 %836, %v176_v0   ;;  %838 = vset.pattern.permute.xlu0 %v904_v2  ;;  %v445_v1 = vrot.slane %v438_v49, %v372_v45  ;;  %v1023_v13 = vrot.slane %v373_v59, %v372_v45  ;;  %v1025_v14 = vrot.slane %v377_v60, %v372_v45 }
  0x26   : > { %644 = vperm.xlu0 %838, %v638_v7   ;;  %v457_v4 = vrot.slane %v439_v50, %v376_v46  ;;  %v525_v7 = vrot.slane %v511_v44, %v372_v45  ;;  %v1027_v15 = vrot.slane %v381_v61, %v372_v45  ;;  %v1029_v16 = vrot.slane %v385_v62, %v372_v45 }
  0x27   : > { %v1031_v19 = vrot.slane %v445_v1, %v372_v45  ;;  %v1039_v23 = vrot.slane %v517_v5, %v372_v45  ;;  %v1041_v24 = vrot.slane %v521_v6, %v372_v45  ;;  %v1051_v29 = vrot.slane %v581_v11, %v372_v45 }
  0x28   : > { %v1037_v22 = vrot.slane %v457_v4, %v372_v45  ;;  %v1043_v25 = vrot.slane %v525_v7, %v372_v45  ;;  %v1053_v30 = vrot.slane %v585_v12, %v372_v45 }
  0x29   : > { %365 = vperm.xlu1 %836, %v177_v3   ;;  %v453_v3 = vrot.slane %v439_v50, %v372_v45 }
  0x2a   : > { %659 = vperm.xlu0 %838, %v641_v8   ;;  %v573_v8 = vrot.slane %v566_v54, %v372_v45 }
  0x2b   : > { %v1035_v21 = vrot.slane %v453_v3, %v372_v45 }
  0x2c   : > { %v1045_v26 = vrot.slane %v573_v8, %v372_v45 }
  0x2d   : > { %839 = vset.pattern.permute.xlu1 %v904_v2  ;;  %v449_v2 = vrot.slane %v438_v49, %v376_v46 }
  0x2e   : > { %649 = vperm.xlu1 %839, %v639_v9   ;;  %v529_v9 = vrot.slane %v511_v44, %v376_v46 }
  0x2f   : > { %v1033_v20 = vrot.slane %v449_v2, %v372_v45 }
  0x30   : > { %v1047_v27 = vrot.slane %v529_v9, %v372_v45 }
  0x32   : > { %654 = vperm.xlu1 %839, %v640_v10   ;;  %v577_v10 = vrot.slane %v566_v54, %v376_v46 }
  0x34   : > { %v1049_v28 = vrot.slane %v577_v10, %v372_v45 }
  0x8e   : > { %v207_v63 = vpop.permute.xlu1 %206  ;;  %v197_v0 = vpop.permute.xlu0 %196 }
  0x8f   : > { %v260_v31 = vmul.f32 %v1007_v47, %v207_v63  ;;  %v261_v32 = vmul.f32 %v1009_v48, %v207_v63  ;;  %v262_v33 = vmul.f32 %v1011_v51, %v207_v63  ;;  %v263_v34 = vmul.f32 %v1013_v52, %v207_v63 }
  0x90   : > { %v252_v35 = vmul.f32 %v1007_v47, %v197_v0  ;;  %v253_v36 = vmul.f32 %v1009_v48, %v197_v0  ;;  %v254_v37 = vmul.f32 %v1011_v51, %v197_v0  ;;  %v255_v38 = vmul.f32 %v1013_v52, %v197_v0 }
  0x92   : > { %v212_v17 = vpop.permute.xlu1 %211  ;;  %v202_v18 = vpop.permute.xlu0 %201 }
  0x93   : > { %v256_v39 = vmul.f32 %v1007_v47, %v202_v18  ;;  %v257_v40 = vmul.f32 %v1009_v48, %v202_v18  ;;  %v258_v41 = vmul.f32 %v1011_v51, %v202_v18  ;;  %v259_v42 = vmul.f32 %v1013_v52, %v202_v18 }
  0x94   : > { %v264_v54 = vmul.f32 %v1007_v47, %v212_v17  ;;  %v265_v58 = vmul.f32 %v1009_v48, %v212_v17  ;;  %v266_v59 = vmul.f32 %v1011_v51, %v212_v17  ;;  %v267_v60 = vmul.f32 %v1013_v52, %v212_v17 }
  0x97   : > { %v274_v43 = vpop.permute.xlu1 %273  ;;  %v270_v44 = vpop.permute.xlu0 %269 }
  0x98   : > { %v324_v45 = vmul.f32 %v1015_v53, %v274_v43  ;;  %v325_v46 = vmul.f32 %v1017_v55, %v274_v43  ;;  %v326_v49 = vmul.f32 %v1019_v56, %v274_v43  ;;  %v327_v50 = vmul.f32 %v1021_v57, %v274_v43 }
  0x99   : > { %v320_v61 = vmul.f32 %v1015_v53, %v270_v44  ;;  %v321_v62 = vmul.f32 %v1017_v55, %v270_v44  ;;  %v322_v63 = vmul.f32 %v1019_v56, %v270_v44  ;;  %v323_v0 = vmul.f32 %v1021_v57, %v270_v44 }
  0x9a   : > { %v340_v1 = vadd.f32 %v324_v45, %v256_v39  ;;  %v341_v2 = vadd.f32 %v325_v46, %v257_v40  ;;  %v342_v3 = vadd.f32 %v326_v49, %v258_v41  ;;  %v343_v4 = vadd.f32 %v327_v50, %v259_v42 }
  0x9b   : > { %v278_v5 = vpop.permute.xlu1 %277  ;;  %v282_v47 = vpop.permute.xlu0 %281  ;;  %v336_v11 = vadd.f32 %v320_v61, %v252_v35  ;;  %v337_v12 = vadd.f32 %v321_v62, %v253_v36  ;;  %v338_v17 = vadd.f32 %v322_v63, %v254_v37  ;;  %v339_v18 = vadd.f32 %v323_v0, %v255_v38 }
  0x9c   : > { %v328_v48 = vmul.f32 %v1015_v53, %v278_v5  ;;  %v329_v51 = vmul.f32 %v1017_v55, %v278_v5  ;;  %v330_v52 = vmul.f32 %v1019_v56, %v278_v5  ;;  %v331_v6 = vmul.f32 %v1021_v57, %v278_v5 }
  0x9d   : > { %v332_v7 = vmul.f32 %v1015_v53, %v282_v47  ;;  %v333_v8 = vmul.f32 %v1017_v55, %v282_v47  ;;  %v334_v9 = vmul.f32 %v1019_v56, %v282_v47  ;;  %v335_v10 = vmul.f32 %v1021_v57, %v282_v47 }
  0x9e   : > { %v1087_v39 = vadd.f32 %v328_v48, %v260_v31  ;;  %v1089_v40 = vadd.f32 %v329_v51, %v261_v32  ;;  %v1091_v41 = vadd.f32 %v330_v52, %v262_v33  ;;  %v1093_v42 = vadd.f32 %v331_v6, %v263_v34 }
  0x9f   : > { %v1095_v43 = vadd.f32 %v332_v7, %v264_v54  ;;  %v1097_v53 = vadd.f32 %v333_v8, %v265_v58  ;;  %v1099_v55 = vadd.f32 %v334_v9, %v266_v59  ;;  %v1101_v56 = vadd.f32 %v335_v10, %v267_v60 }
  0xa0   : > { %v354_v57 = vpop.permute.xlu1 %353  ;;  %v358_v35 = vpop.permute.xlu0 %357 }
  0xa1   : > { %v406_v31 = vmul.f32 %v1023_v13, %v354_v57  ;;  %v407_v32 = vmul.f32 %v1025_v14, %v354_v57  ;;  %v408_v33 = vmul.f32 %v1027_v15, %v354_v57  ;;  %v409_v34 = vmul.f32 %v1029_v16, %v354_v57 }
  0xa2   : > { %v478_v36 = vmul.f32 %v1031_v19, %v354_v57  ;;  %v479_v37 = vmul.f32 %v1033_v20, %v354_v57  ;;  %v480_v38 = vmul.f32 %v1035_v21, %v354_v57  ;;  %v481_v44 = vmul.f32 %v1037_v22, %v354_v57 }
  0xa3   : > { %v422_v45 = vadd.f32 %v406_v31, %v336_v11  ;;  %v423_v46 = vadd.f32 %v407_v32, %v337_v12  ;;  %v424_v49 = vadd.f32 %v408_v33, %v338_v17  ;;  %v425_v50 = vadd.f32 %v409_v34, %v339_v18 }
  0xa4   : > { %v1111_v54 = vpop.permute.xlu1 %361  ;;  %v410_v58 = vmul.f32 %v1023_v13, %v358_v35  ;;  %v411_v59 = vmul.f32 %v1025_v14, %v358_v35  ;;  %v412_v60 = vmul.f32 %v1027_v15, %v358_v35  ;;  %v413_v61 = vmul.f32 %v1029_v16, %v358_v35 }
  0xa5   : > { %v494_v62 = vadd.f32 %v478_v36, %v422_v45  ;;  %v495_v63 = vadd.f32 %v479_v37, %v423_v46  ;;  %v496_v0 = vadd.f32 %v480_v38, %v424_v49  ;;  %v497_v5 = vadd.f32 %v481_v44, %v425_v50  ;;  %v645_v10 = vpop.permute.xlu0 %644 }
  0xa6   : > { %v606_v47 = vmul.f32 %v1045_v26, %v422_v45  ;;  %v607_v48 = vmul.f32 %v1049_v28, %v423_v46  ;;  %v608_v51 = vmul.f32 %v1051_v29, %v424_v49  ;;  %v609_v52 = vmul.f32 %v1053_v30, %v425_v50 }
  0xa7   : > { %v550_v6 = vmul.f32 %v1039_v23, %v494_v62  ;;  %v551_v7 = vmul.f32 %v1041_v24, %v495_v63  ;;  %v552_v8 = vmul.f32 %v1043_v25, %v496_v0  ;;  %v553_v9 = vmul.f32 %v1047_v27, %v497_v5 }
  0xa8   : > { %v426_v11 = vadd.f32 %v410_v58, %v340_v1  ;;  %v427_v12 = vadd.f32 %v411_v59, %v341_v2  ;;  %v428_v17 = vadd.f32 %v412_v60, %v342_v3  ;;  %v429_v18 = vadd.f32 %v413_v61, %v343_v4  ;;  %v366_v57 = vpop.permute.xlu1 %365 }
  0xa9   : > { %v622_v31 = vadd.f32 %v606_v47, %v550_v6  ;;  %v623_v32 = vadd.f32 %v607_v48, %v551_v7  ;;  %v624_v33 = vadd.f32 %v608_v51, %v552_v8  ;;  %v625_v34 = vadd.f32 %v609_v52, %v553_v9 }
  0xaa   : > { %v482_v36 = vmul.f32 %v1031_v19, %v358_v35  ;;  %v483_v37 = vmul.f32 %v1033_v20, %v358_v35  ;;  %v484_v38 = vmul.f32 %v1035_v21, %v358_v35  ;;  %v485_v44 = vmul.f32 %v1037_v22, %v358_v35 }
  0xab   : > { %v662_v45 = vadd.f32 %v645_v10, %v622_v31  ;;  %v663_v46 = vadd.f32 %v645_v10, %v623_v32  ;;  %v664_v49 = vadd.f32 %v645_v10, %v624_v33  ;;  %v665_v1 = vadd.f32 %v645_v10, %v625_v34 }
  0xac   : > { %v498_v2 = vadd.f32 %v482_v36, %v426_v11  ;;  %v499_v3 = vadd.f32 %v483_v37, %v427_v12  ;;  %v500_v4 = vadd.f32 %v484_v38, %v428_v17  ;;  %v501_v50 = vadd.f32 %v485_v44, %v429_v18 }
  0xad   : > { %678 = vst [vmem:[%s1132_s29] sm:$0xff] %v662_v45  ;;  %679 = vst [vmem:[%s1132_s29 + $0x8] sm:$0xff] %v663_v46  ;;  %v610_v35 = vmul.f32 %v1045_v26, %v426_v11  ;;  %v611_v58 = vmul.f32 %v1049_v28, %v427_v12  ;;  %v612_v59 = vmul.f32 %v1051_v29, %v428_v17  ;;  %v650_v5 = vpop.permute.xlu1 %649 }
  0xae   : > { %680 = vst [vmem:[%s1132_s29 + $0x10] sm:$0xff] %v664_v49  ;;  %681 = vst [vmem:[%s1132_s29 + $0x18] sm:$0xff] %v665_v1  ;;  %v613_v60 = vmul.f32 %v1053_v30, %v429_v18  ;;  %v554_v61 = vmul.f32 %v1039_v23, %v498_v2  ;;  %v555_v62 = vmul.f32 %v1041_v24, %v499_v3 }
  0xaf   : > { %v556_v63 = vmul.f32 %v1043_v25, %v500_v4  ;;  %v557_v0 = vmul.f32 %v1047_v27, %v501_v50  ;;  %v418_v47 = vmul.f32 %v1023_v13, %v366_v57  ;;  %v419_v48 = vmul.f32 %v1025_v14, %v366_v57 }
  0xb0   : > { %v420_v51 = vmul.f32 %v1027_v15, %v366_v57  ;;  %v421_v52 = vmul.f32 %v1029_v16, %v366_v57  ;;  %v626_v6 = vadd.f32 %v610_v35, %v554_v61  ;;  %v627_v7 = vadd.f32 %v611_v58, %v555_v62 }
  0xb1   : > { %v628_v8 = vadd.f32 %v612_v59, %v556_v63  ;;  %v629_v9 = vadd.f32 %v613_v60, %v557_v0  ;;  %v434_v10 = vadd.f32 %v418_v47, %v1095_v43  ;;  %v435_v11 = vadd.f32 %v419_v48, %v1097_v53  ;;  %v660_v63 = vpop.permute.xlu0 %659 }
  0xb2   : > { %v436_v12 = vadd.f32 %v420_v51, %v1099_v55  ;;  %v437_v17 = vadd.f32 %v421_v52, %v1101_v56  ;;  %v666_v18 = vadd.f32 %v650_v5, %v626_v6  ;;  %v667_v31 = vadd.f32 %v650_v5, %v627_v7 }
  0xb3   : > { %v668_v32 = vadd.f32 %v650_v5, %v628_v8  ;;  %v669_v33 = vadd.f32 %v650_v5, %v629_v9  ;;  %v490_v34 = vmul.f32 %v1031_v19, %v366_v57  ;;  %v491_v36 = vmul.f32 %v1033_v20, %v366_v57 }
  0xb4   : > { %v492_v37 = vmul.f32 %v1035_v21, %v366_v57  ;;  %v493_v38 = vmul.f32 %v1037_v22, %v366_v57  ;;  %682 = vst [vmem:[%s1132_s29 + $0x20] sm:$0xff] %v666_v18  ;;  %683 = vst [vmem:[%s1132_s29 + $0x28] sm:$0xff] %v667_v31  ;;  %v618_v43 = vmul.f32 %v1045_v26, %v434_v10 }
  0xb5   : > { %684 = vst [vmem:[%s1132_s29 + $0x30] sm:$0xff] %v668_v32  ;;  %685 = vst [vmem:[%s1132_s29 + $0x38] sm:$0xff] %v669_v33  ;;  %v619_v53 = vmul.f32 %v1049_v28, %v435_v11  ;;  %v620_v55 = vmul.f32 %v1051_v29, %v436_v12  ;;  %v621_v56 = vmul.f32 %v1053_v30, %v437_v17 }
  0xb6   : > { %v506_v44 = vadd.f32 %v490_v34, %v434_v10  ;;  %v507_v45 = vadd.f32 %v491_v36, %v435_v11  ;;  %v508_v46 = vadd.f32 %v492_v37, %v436_v12  ;;  %v509_v49 = vadd.f32 %v493_v38, %v437_v17 }
  0xb7   : > { %v414_v1 = vmul.f32 %v1023_v13, %v1111_v54  ;;  %v415_v57 = vmul.f32 %v1025_v14, %v1111_v54  ;;  %v416_v2 = vmul.f32 %v1027_v15, %v1111_v54  ;;  %v417_v3 = vmul.f32 %v1029_v16, %v1111_v54 }
  0xb8   : > { %v562_v4 = vmul.f32 %v1039_v23, %v506_v44  ;;  %v563_v50 = vmul.f32 %v1041_v24, %v507_v45  ;;  %v564_v35 = vmul.f32 %v1043_v25, %v508_v46  ;;  %v565_v58 = vmul.f32 %v1047_v27, %v509_v49 }
  0xb9   : > { %v430_v59 = vadd.f32 %v414_v1, %v1087_v39  ;;  %v431_v13 = vadd.f32 %v415_v57, %v1089_v40  ;;  %v432_v14 = vadd.f32 %v416_v2, %v1091_v41  ;;  %v433_v60 = vadd.f32 %v417_v3, %v1093_v42 }
  0xba   : > { %v634_v15 = vadd.f32 %v618_v43, %v562_v4  ;;  %v635_v61 = vadd.f32 %v619_v53, %v563_v50  ;;  %v636_v16 = vadd.f32 %v620_v55, %v564_v35  ;;  %v637_v62 = vadd.f32 %v621_v56, %v565_v58 }
  0xbb   : > { %v486_v0 = vmul.f32 %v1031_v19, %v1111_v54  ;;  %v487_v39 = vmul.f32 %v1033_v20, %v1111_v54  ;;  %v488_v40 = vmul.f32 %v1035_v21, %v1111_v54  ;;  %v489_v41 = vmul.f32 %v1037_v22, %v1111_v54 }
  0xbc   : > { %v674_v42 = vadd.f32 %v660_v63, %v634_v15  ;;  %v675_v5 = vadd.f32 %v660_v63, %v635_v61  ;;  %v676_v47 = vadd.f32 %v660_v63, %v636_v16  ;;  %v677_v48 = vadd.f32 %v660_v63, %v637_v62 }
  0xbd   : > { %v502_v51 = vadd.f32 %v486_v0, %v430_v59  ;;  %v503_v52 = vadd.f32 %v487_v39, %v431_v13  ;;  %v504_v6 = vadd.f32 %v488_v40, %v432_v14  ;;  %v505_v7 = vadd.f32 %v489_v41, %v433_v60 }
  0xbe   : > { %690 = vst [vmem:[%s1132_s29 + $0x60] sm:$0xff] %v674_v42  ;;  %691 = vst [vmem:[%s1132_s29 + $0x68] sm:$0xff] %v675_v5  ;;  %v614_v19 = vmul.f32 %v1045_v26, %v430_v59  ;;  %v615_v20 = vmul.f32 %v1049_v28, %v431_v13  ;;  %v616_v21 = vmul.f32 %v1051_v29, %v432_v14  ;;  %v655_v26 = vpop.permute.xlu1 %654 }
  0xbf   : > { %692 = vst [vmem:[%s1132_s29 + $0x70] sm:$0xff] %v676_v47  ;;  %693 = vst [vmem:[%s1132_s29 + $0x78] sm:$0xff] %v677_v48  ;;  %v617_v22 = vmul.f32 %v1053_v30, %v433_v60  ;;  %v558_v54 = vmul.f32 %v1039_v23, %v502_v51  ;;  %v559_v8 = vmul.f32 %v1041_v24, %v503_v52 }
  0xc0   : > { %v560_v9 = vmul.f32 %v1043_v25, %v504_v6  ;;  %v561_v10 = vmul.f32 %v1047_v27, %v505_v7 }
  0xc1   : > { %v630_v28 = vadd.f32 %v614_v19, %v558_v54  ;;  %v631_v29 = vadd.f32 %v615_v20, %v559_v8 }
  0xc2   : > { %v632_v30 = vadd.f32 %v616_v21, %v560_v9  ;;  %v633_v11 = vadd.f32 %v617_v22, %v561_v10 }
  0xc3   : > { %v670_v23 = vadd.f32 %v655_v26, %v630_v28  ;;  %v671_v24 = vadd.f32 %v655_v26, %v631_v29 }
  0xc4   : > { %v672_v25 = vadd.f32 %v655_v26, %v632_v30  ;;  %v673_v27 = vadd.f32 %v655_v26, %v633_v11 }
  0xc5   : > { %686 = vst [vmem:[%s1132_s29 + $0x40] sm:$0xff] %v670_v23  ;;  %687 = vst [vmem:[%s1132_s29 + $0x48] sm:$0xff] %v671_v24 }
  0xc6   : > { %688 = vst [vmem:[%s1132_s29 + $0x50] sm:$0xff] %v672_v25  ;;  %689 = vst [vmem:[%s1132_s29 + $0x58] sm:$0xff] %v673_v27 }
  0xc7   : > { %853 = shalt.err (!%p850_p3)
}
  0xc8   : > { %s854_s17 = scalar_lea.hbm %s1207_s6, 2048  ;;  %s858_s24 = scalar_lea.hbm %s1261_s3, 4096 }
  0xc9   : > { %p855_p4 = scmp.ne.s32.totalorder %s1207_s6, %s854_s17  ;;  %p859_p9 = scmp.lt.u32.totalorder %s1207_s6, %s1261_s3 }
  0xca   : > { %p860_p10 = scmp.lt.u32.totalorder %s858_s24, %s854_s17  ;;  %p862_p12 = scmp.lt.u32.totalorder %s854_s17, %s1207_s6 }
  0xcb   : > { %p856_p7 = pnand %p855_p4, %p969_p5 }
  0xcc   : > { %p861_p11 = por %p860_p10, %p859_p9 }
  0xcd   : > { %p857_p8 = pneg %p856_p7 }
  0xce   : > { %p863_p13 = por %p862_p12, %p861_p11 }
  0xd0   : > { %p864_p0 = pnand %p863_p13, %p857_p8 }
  0xd2   : > { %867 = shalt.err (!%p864_p0)
}
  0xd3   : > { %s908_s27 = smov 512   ;;  %s909_s28 = smov 1024  }
  0xd4   : > { %s910_s29 = smov 32  }
  0xd5   : > { %787 = dma.vmem_to_hbm [thread:$0]  (%p969_p5), %s1209_s4, 2048, %s1207_s6, %s1217_s7, %s908_s27, %s909_s28, %s910_s29  }
  0xd6 PF: > { %p793_p1 = scmp.ge.s32.totalorder %s902_s15, 2  ;;  %s723_s30 = sand.u32 1, %s890_s12  }
  0xd7   : > { %s724_s16 = scalar_lea.sflag [#allocation3], %s723_s30 }
  0xd8   : > { %p790_p2 = pnand %p793_p1, %p973_p6 }
  0xda   : > { %885 = dma.done.wait (!%p790_p2), %s724_s16, 2048  }
  0xdb   : > { %887 = vsyncadd (!%p790_p2), %s724_s16, 4294965248  ;;  %p13_p3 = scmp.ge.s32.totalorder %s956_s18, 4   ;;  %s1264_s12 = smov %s894_s13 }
  0xdc   : > { %s1265_s13 = smov %s898_s14  ;;  %s1266_s14 = smov %s967_s21 }
  0xdd   : > { %s1267_s15 = smov %s956_s18  ;;  %15 = sbr.rel (!%p13_p3) target bundleno = 3 (0x3), region = 67 }
  0xe4   :  { %729 = vsyncpa [#allocation3], 1 }
  0xe5   :  { %731 = vsyncpa [#allocation3 + $0x1], 1 }

</bundles_post_ra>
